<compile_context>
chip_gen: v7x
topology: tpu7x:2x2x1
jax: 0.10.0
libtpu: 0.0.40
codegen_flags: <defaults>
</compile_context>

<pallas_src>
import jax
import jax.numpy as jnp
from jax.experimental import pallas as pl
from jax.experimental.pallas import tpu as pltpu

_TB_MAX = 2048        # max batch-tile rows (multiple of 16 for bf16 sublane packing)
_SMALL_BATCH = 1024   # below this, plain XLA beats the custom call


def _cdiv(a, b):
    return (a + b - 1) // b


def _round_up(x, m):
    return ((x + m - 1) // m) * m


def _choose_batch_tile(B):
    """Pick the batch tile size (rows)."""
    if B <= _TB_MAX:
        return B                      # full-dim block: always a legal BlockSpec
    num_tiles = _cdiv(B, _TB_MAX)
    if num_tiles % 2:                 # even tile count -> both v7x TCs stay busy
        num_tiles += 1
    return _round_up(_cdiv(B, num_tiles), 16)


def _mlp_kernel(x_ref, w1_ref, b1_ref, w2_ref, b2_ref, o_ref):
    # fc1: [TB,16](bf16) @ [16,32](bf16) -> f32 accumulate on the MXU.
    h = jnp.dot(x_ref[...], w1_ref[...], preferred_element_type=jnp.float32)
    h = jnp.maximum(h + b1_ref[...], 0.0)                    # bias + ReLU (f32, VPU)
    # fc2: [TB,32](bf16) @ [32,10](bf16) -> f32 accumulate.
    out = jnp.dot(h.astype(w2_ref.dtype), w2_ref[...],
                  preferred_element_type=jnp.float32)
    o_ref[...] = (out + b2_ref[...]).astype(o_ref.dtype)


@jax.jit
def _forward_pallas(x, w1, b1, w2, b2):
    B, K = x.shape
    N1 = w1.shape[1]
    N2 = w2.shape[1]

    # Halve the dominant HBM read traffic; accumulation stays f32 in-kernel.
    xb = x.astype(jnp.bfloat16)
    w1b = w1.astype(jnp.bfloat16)
    w2b = w2.astype(jnp.bfloat16)
    b1_2d = b1.reshape(1, N1).astype(jnp.float32)
    b2_2d = b2.reshape(1, N2).astype(jnp.float32)

    tb = _choose_batch_tile(B)
    num_tiles = _cdiv(B, tb)

    cost = pl.CostEstimate(
        flops=2 * B * (K * N1 + N1 * N2),
        transcendentals=0,
        bytes_accessed=(B * K * 2 + B * N2 * 4
                        + (K * N1 + N1 * N2) * 2 + (N1 + N2) * 4),
    )

    return pl.pallas_call(
        _mlp_kernel,
        out_shape=jax.ShapeDtypeStruct((B, N2), jnp.float32),
        grid=(num_tiles,),
        in_specs=[
            # x streams in batch tiles; weights/biases use constant index_maps
            # so they are DMA'd once and stay VMEM-resident across the grid.
            pl.BlockSpec((tb, K), lambda i: (i, 0)),
            pl.BlockSpec((K, N1), lambda i: (0, 0)),
            pl.BlockSpec((1, N1), lambda i: (0, 0)),
            pl.BlockSpec((N1, N2), lambda i: (0, 0)),
            pl.BlockSpec((1, N2), lambda i: (0, 0)),
        ],
        out_specs=pl.BlockSpec((tb, N2), lambda i: (i, 0)),
        compiler_params=pltpu.CompilerParams(
            dimension_semantics=("parallel",)),
        cost_estimate=cost,
    )(xb, w1b, b1_2d, w2b, b2_2d)


@jax.jit
def _forward_xla(x, w1, b1, w2, b2):
    return jnp.maximum(x @ w1 + b1, 0.0) @ w2 + b2


def simple_classifier_forward(x, w1, b1, w2, b2, *, min_pallas_batch=_SMALL_BATCH):
    """x: [B, 16]; w1: [16, 32]; b1: [32]; w2: [32, 10]; b2: [10] -> [B, 10] (f32)."""
    if x.shape[0] < min_pallas_batch:
        # Small-batch fast path: pallas_call fixed cost can't be amortized.
        return _forward_xla(x, w1, b1, w2, b2)
    return _forward_pallas(x, w1, b1, w2, b2)


def _init_linear(key, in_features, out_features, dtype=jnp.float32):
    """Deterministic init mimicking nn.Linear defaults (uniform +/- 1/sqrt(in))."""
    kw, kb = jax.random.split(key)
    bound = 1.0 / jnp.sqrt(in_features)
    # PyTorch stores weight as (out, in); we keep (in, out) so kernel does x @ W.
    w = jax.random.uniform(kw, (in_features, out_features), dtype,
                           minval=-bound, maxval=bound)
    b = jax.random.uniform(kb, (out_features,), dtype,
                           minval=-bound, maxval=bound)
    return w, b


if __name__ == "__main__":
    key = jax.random.PRNGKey(0)
    k_x, k_fc1, k_fc2 = jax.random.split(key, 3)

    B = 2
    x = jax.random.normal(k_x, (B, 16), jnp.float32)
    w1, b1 = _init_linear(k_fc1, 16, 32)
    w2, b2 = _init_linear(k_fc2, 32, 10)

    # Force the Pallas path so the kernel itself runs at this small demo batch.
    out = simple_classifier_forward(x, w1, b1, w2, b2, min_pallas_batch=0)
    jax.block_until_ready(out)
    assert out.shape == (B, 10), out.shape

    # Reference mirroring the kernel's bf16-input / f32-accumulate math.
    xb, w1b, w2b = (a.astype(jnp.bfloat16) for a in (x, w1, w2))
    h_ref = jnp.maximum(
        jnp.dot(xb, w1b, preferred_element_type=jnp.float32) + b1, 0.0)
    ref_bf16 = jnp.dot(h_ref.astype(jnp.bfloat16), w2b,
                       preferred_element_type=jnp.float32) + b2
    assert jnp.allclose(out, ref_bf16, atol=1e-3, rtol=1e-3), "mismatch vs bf16 ref"

    # Loose check against pure-f32 module semantics (bf16 casts are the only
    # source of deviation).
    ref_f32 = jnp.maximum(x @ w1 + b1, 0.0) @ w2 + b2
    assert jnp.allclose(out, ref_f32, atol=5e-2, rtol=5e-2), "mismatch vs f32 ref"

    # Small-batch fast path (plain XLA) sanity.
    out_fast = simple_classifier_forward(x, w1, b1, w2, b2)
    jax.block_until_ready(out_fast)
    assert jnp.allclose(out_fast, ref_f32, atol=1e-4, rtol=1e-4)

    print("KERNEL_OK")
</pallas_src>

<mosaic_0001>
module attributes {stable_mosaic.version = 11 : i64} {
  func.func @_mlp_kernel(%arg0: i32, %arg1: memref<2x16xbf16, #tpu.memory_space<vmem>>, %arg2: memref<16x32xbf16, #tpu.memory_space<vmem>>, %arg3: memref<1x32xf32, #tpu.memory_space<vmem>>, %arg4: memref<32x10xbf16, #tpu.memory_space<vmem>>, %arg5: memref<1x10xf32, #tpu.memory_space<vmem>>, %arg6: memref<2x10xf32, #tpu.memory_space<vmem>>) attributes {dimension_semantics = [#tpu.dimension_semantics<parallel>], iteration_bounds = array<i64: 1>, scalar_prefetch = 0 : i64, scratch_operands = 0 : i64, tpu.core_type = #tpu.core_type<tc>, window_params = [{transform_indices = @transform_0, window_bounds = array<i64: 2, 16>}, {pipeline_mode = #tpu.pipeline_mode<synchronous>, transform_indices = @transform_1, window_bounds = array<i64: 16, 32>}, {pipeline_mode = #tpu.pipeline_mode<synchronous>, transform_indices = @transform_2, window_bounds = array<i64: 1, 32>}, {pipeline_mode = #tpu.pipeline_mode<synchronous>, transform_indices = @transform_3, window_bounds = array<i64: 32, 10>}, {pipeline_mode = #tpu.pipeline_mode<synchronous>, transform_indices = @transform_4, window_bounds = array<i64: 1, 10>}, {transform_indices = @transform_5, window_bounds = array<i64: 2, 10>}]} {
    %c0 = arith.constant 0 : index
    %c0_0 = arith.constant 0 : index
    %0 = vector.load %arg1[%c0, %c0_0] : memref<2x16xbf16, #tpu.memory_space<vmem>>, vector<2x16xbf16>
    %c0_1 = arith.constant 0 : index
    %c0_2 = arith.constant 0 : index
    %1 = vector.load %arg2[%c0_1, %c0_2] : memref<16x32xbf16, #tpu.memory_space<vmem>>, vector<16x32xbf16>
    %cst = arith.constant dense<0.000000e+00> : vector<2x32xf32>
    %2 = tpu.matmul %0, %1, %cst {dimension_numbers = #tpu.dot_dimension_numbers<[1], [0], [0], [1], [0, 0, 1, 1], [], []>} : vector<2x16xbf16>, vector<16x32xbf16>, vector<2x32xf32> -> vector<2x32xf32>
    %c0_3 = arith.constant 0 : index
    %c0_4 = arith.constant 0 : index
    %3 = vector.load %arg3[%c0_3, %c0_4] : memref<1x32xf32, #tpu.memory_space<vmem>>, vector<1x32xf32>
    %4 = vector.broadcast %3 : vector<1x32xf32> to vector<2x32xf32>
    %5 = arith.addf %2, %4 : vector<2x32xf32>
    %cst_5 = arith.constant 0.000000e+00 : f32
    %6 = vector.broadcast %cst_5 : f32 to vector<2x32xf32>
    %7 = arith.maximumf %5, %6 : vector<2x32xf32>
    %8 = arith.truncf %7 : vector<2x32xf32> to vector<2x32xbf16>
    %c0_6 = arith.constant 0 : index
    %c0_7 = arith.constant 0 : index
    %9 = vector.load %arg4[%c0_6, %c0_7] : memref<32x10xbf16, #tpu.memory_space<vmem>>, vector<32x10xbf16>
    %cst_8 = arith.constant dense<0.000000e+00> : vector<2x10xf32>
    %10 = tpu.matmul %8, %9, %cst_8 {dimension_numbers = #tpu.dot_dimension_numbers<[1], [0], [0], [1], [0, 0, 1, 1], [], []>} : vector<2x32xbf16>, vector<32x10xbf16>, vector<2x10xf32> -> vector<2x10xf32>
    %c0_9 = arith.constant 0 : index
    %c0_10 = arith.constant 0 : index
    %11 = vector.load %arg5[%c0_9, %c0_10] : memref<1x10xf32, #tpu.memory_space<vmem>>, vector<1x10xf32>
    %12 = vector.broadcast %11 : vector<1x10xf32> to vector<2x10xf32>
    %13 = arith.addf %10, %12 : vector<2x10xf32>
    %c0_11 = arith.constant 0 : index
    %c0_12 = arith.constant 0 : index
    %14 = vector.load %arg6[%c0_11, %c0_12] : memref<2x10xf32, #tpu.memory_space<vmem>>, vector<2x10xf32>
    tpu.vector_store %arg6[%c0_11, %c0_12], %13 {strides = array<i32>} : memref<2x10xf32, #tpu.memory_space<vmem>>, vector<2x10xf32>,
    return
  }
  func.func @transform_0(%arg0: i32) -> (i32, i32) {
    %c0_i32 = arith.constant 0 : i32
    %c0_i32_0 = arith.constant 0 : i32
    return %arg0, %c0_i32 : i32, i32
  }
  func.func @transform_1(%arg0: i32) -> (i32, i32) {
    %c0_i32 = arith.constant 0 : i32
    %c0_i32_0 = arith.constant 0 : i32
    %c0_i32_1 = arith.constant 0 : i32
    return %c0_i32, %c0_i32_0 : i32, i32
  }
  func.func @transform_2(%arg0: i32) -> (i32, i32) {
    %c0_i32 = arith.constant 0 : i32
    %c0_i32_0 = arith.constant 0 : i32
    %c0_i32_1 = arith.constant 0 : i32
    return %c0_i32, %c0_i32_0 : i32, i32
  }
  func.func @transform_3(%arg0: i32) -> (i32, i32) {
    %c0_i32 = arith.constant 0 : i32
    %c0_i32_0 = arith.constant 0 : i32
    %c0_i32_1 = arith.constant 0 : i32
    return %c0_i32, %c0_i32_0 : i32, i32
  }
  func.func @transform_4(%arg0: i32) -> (i32, i32) {
    %c0_i32 = arith.constant 0 : i32
    %c0_i32_0 = arith.constant 0 : i32
    %c0_i32_1 = arith.constant 0 : i32
    return %c0_i32, %c0_i32_0 : i32, i32
  }
  func.func @transform_5(%arg0: i32) -> (i32, i32) {
    %c0_i32 = arith.constant 0 : i32
    %c0_i32_0 = arith.constant 0 : i32
    return %arg0, %c0_i32 : i32, i32
  }
}

</mosaic_0001>

<bundles_post_ra>
// kernel: _forward_pallas.1
= control target key start
LH: loop header
LB: loop body
LE: loop exit
PB: predicated region body
PF: predicated region fallthrough
CT: control target
= control target key end

     0   :  { %v223_v1 = vmov 0.0   ;;  %vm38_vm0 = vcmask 130048   ;;  %vm224_vm1 = vmmov 0   ;;  %s286_s0 = inlined_call_operand.vmem [shape: bf16[2,16], index: 0, kind: input, shape index: {}]   ;;  %s287_s1 = inlined_call_operand.vmem [shape: bf16[16,32], index: 1, kind: input, shape index: {}]   ;;  %s288_s2 = inlined_call_operand.vmem [shape: f32[1,32], index: 2, kind: input, shape index: {}]   ;;  %s289_s3 = inlined_call_operand.vmem [shape: bf16[32,10], index: 3, kind: input, shape index: {}]   ;;  %s290_s4 = inlined_call_operand.vmem [shape: f32[1,10], index: 4, kind: input, shape index: {}]   ;;  %s291_s5 = inlined_call_operand.hbm [shape: f32[2,10], index: 5, kind: output, shape index: {}]  }
   0x1   :  { %v196_v0 = vld [vmem:[%s287_s1] sm:$0xff]   ;;  %179 = vmatprep.subr.bf16.mxu0 %v223_v1  ;;  %185 = vmatprep.subr.bf16.mxu1 %v223_v1 }
   0x2   :  { %v22_v2 = vld [vmem:[%s286_s0] sm:$0x1]  ;;  %180 = vmatpush3.bf16.msra.mxu0 %v196_v0  ;;  %181 = vmatprep.mubr.msk.bf16.mxu0 %vm224_vm1, %v223_v1 }
   0x3   :  { %189 = vmatprep.mubr.msk.bf16.mxu1 %vm224_vm1, %v223_v1 }
   0x4   :  { %10 = vsyncpa [#allocation3], 0  ;;  %v197_v3 = vld [vmem:[%s289_s3] sm:$0xff]   ;;  %v198_v4 = vld [vmem:[%s289_s3 + $0x8] sm:$0xff]   ;;  %vm107_vm2 = vcmask 261120   ;;  %s225_s28 = smov [#allocation2]  }
   0x5   :  { %182 = vmatmul.mubr.msk.bf16.vlgmr.msra.gmra.mrb[0].mxu0 %vm38_vm0, %v22_v2  ;;  %186 = vmatpush3.bf16.msra.mxu1 %v197_v3  ;;  %v167_v5 = vld [vmem:[%s288_s2] ss:$0 sm:$0xff]  ;;  %s159_s3 = sshll.u32 %s225_s28, 4  ;;  %vm151_vm3 = vcmask 74752   ;;  %s160_s3 = int_to_ptr.vmem [resolvable:$true] %s159_s3 }
   0x6   :  { %187 = vmatprep.subr.bf16.mxu1 %v223_v1  ;;  %v170_v13 = vld [vmem:[%s290_s4] ss:$0 sm:$0xff]  ;;  %s199_s2 = scalar_lea.vmem %s160_s3, 32  ;;  %p204_p1 = scmp.lt.s32.totalorder %s160_s3, %s160_s3 }
   0x7   :  { %p200_p0 = scmp.ne.s32.totalorder %s160_s3, %s199_s2  ;;  %p205_p2 = scmp.lt.s32.totalorder %s199_s2, %s199_s2 }
   0x9   :  { %188 = vmatpush3.bf16.msra.mxu1 %v198_v4  ;;  %p206_p3 = por %p205_p2, %p204_p1 }
   0xb   :  { %p207_p4 = pnand %p206_p3, %p200_p0 }
  0xd8   :  { %v76_v6 = vpop.f32.mrb[0].mxu0 }
  0xd9   :  { %v77_v7 = vadd.f32 %v167_v5, %v76_v6  ;;  %v183_v8 = vpop.f32.mrb[1].mxu0 }
  0xda   :  { %v79_v9 = vpop.f32.mrb[2].mxu0 }
  0xdb   :  { %v82_v10 = vmax.f32 %v77_v7, 0.0  ;;  %v184_v11 = vpop.f32.mrb[3].mxu0 }
  0xdd   :  { %v83_v12 = vpack.c.bf16 %v82_v10, %v82_v10 }
  0xdf   :  { %190 = vmatmul.mubr.msk.bf16.vlgmr.msra.gmra.mrb[0].mxu1 %vm107_vm2, %v83_v12 }
 0x1b2   :  { %v145_v14 = vpop.f32.mrb[0].mxu1 }
 0x1b3   :  { %v146_v15 = vadd.f32 %v170_v13, %v145_v14  ;;  %v191_v16 = vpop.f32.mrb[1].mxu1 }
 0x1b4   :  { %v148_v17 = vpop.f32.mrb[2].mxu1 }
 0x1b5   :  { %v192_v18 = vpop.f32.mrb[3].mxu1  ;;  %152 = vst.msk [vmem:[#allocation2] sm:$0x3] %vm151_vm3, %v146_v15 }
 0x1b6   :  { %210 = shalt.err (!%p207_p4)
}
 0x1b7   :  { %s211_s4 = scalar_lea.hbm %s291_s5, 32 }
 0x1b8   :  { %p212_p5 = scmp.ne.s32.totalorder %s291_s5, %s211_s4  ;;  %p215_p6 = scmp.lt.u32.totalorder %s211_s4, %s291_s5 }
 0x1ba   :  { %p217_p7 = pnand %p215_p6, %p212_p5 }
 0x1bc   :  { %220 = shalt.err (!%p217_p7)
}
 0x1bd   :  { %162 = dma.vmem_to_hbm [thread:$0]  %s160_s3, 32, %s291_s5, [#allocation3]  }
 0x1be   :  { %221 = dma.done.wait [#allocation3], 32  }
 0x1bf   :  { %222 = vsyncadd [#allocation3], 4294967264 }
 0x1c0   :  { %166 = vsyncpa [#allocation3], 1 }

</bundles_post_ra>
